<compile_context>
chip_gen: v7x
topology: tpu7x:2x2x1
jax: 0.10.0
libtpu: 0.0.40
codegen_flags: <defaults>
</compile_context>

<pallas_src>
import functools
import math

import jax
import jax.numpy as jnp
from jax.experimental import pallas as pl
from jax.experimental.pallas import tpu as pltpu


def self_attention_kernel(x_ref, w_ref, b_ref, o_ref, *, dk):
    Bt, S, D = x_ref.shape

    # Flatten batch+seq: one 2-D MXU push for the fused Q/K/V projection.
    x2d = x_ref[...].reshape(Bt * S, D)        # bf16
    w = w_ref[...]                             # (D, 3*dk) bf16 (1/sqrt(dk) pre-folded into q cols)
    b = b_ref[...]                             # (1, 3*dk)  f32 (1/sqrt(dk) pre-folded into q bias)

    qkv = jnp.dot(x2d, w, preferred_element_type=jnp.float32) + b     # (Bt*S, 3*dk) f32
    qkv = qkv.reshape(Bt, S, 3 * dk)

    # bf16 operands for the second-stage MXU contractions (f32 accumulation).
    q = qkv[..., 0 * dk:1 * dk].astype(jnp.bfloat16)
    k = qkv[..., 1 * dk:2 * dk].astype(jnp.bfloat16)
    v = qkv[..., 2 * dk:3 * dk].astype(jnp.bfloat16)

    # Scores: contract last dims directly (no explicit transpose of k).
    s = jnp.einsum("bqd,bkd->bqk", q, k, preferred_element_type=jnp.float32)  # (Bt, S, S)

    # Numerically stable softmax; exact EUP reciprocal (approx buys no speed here).
    m = jnp.max(s, axis=-1, keepdims=True)
    e = jnp.exp(s - m)
    p = e * pl.reciprocal(jnp.sum(e, axis=-1, keepdims=True), approx=False)

    out = jnp.einsum("bqk,bkd->bqd", p.astype(jnp.bfloat16), v,
                     preferred_element_type=jnp.float32)              # (Bt, S, dk)
    o_ref[...] = out.astype(o_ref.dtype)


def prepare_self_attention_params(wq, bq, wk, bk, wv, bv, *, sqrt_dk):
    """One-time parameter prep (call at init time, NOT per forward).

    wq/wk/wv: (D, dk) pre-transposed PyTorch Linear weights; bq/bk/bv: (1, dk).
    Folds the 1/sqrt(dk) score scale into the q columns/bias and fuses Q/K/V into a
    single (D, 3*dk) bf16 weight and a (1, 3*dk) f32 bias.
    """
    inv = 1.0 / float(sqrt_dk)
    wqkv = jnp.concatenate([wq * inv, wk, wv], axis=1).astype(jnp.bfloat16)   # (D, 3*dk)
    bqkv = jnp.concatenate([bq * inv, bk, bv], axis=1).astype(jnp.float32)    # (1, 3*dk)
    return wqkv, bqkv


@functools.partial(jax.jit, static_argnames=("dk", "batch_block", "out_dtype"))
def _self_attention_call(feature, wqkv, bqkv, *, dk, batch_block, out_dtype):
    B, S, D = feature.shape
    # Only remaining per-call prep; fused into the jitted dispatch.
    x_bf16 = feature.astype(jnp.bfloat16)

    grid = (pl.cdiv(B, batch_block),)
    kernel = functools.partial(self_attention_kernel, dk=dk)

    return pl.pallas_call(
        kernel,
        out_shape=jax.ShapeDtypeStruct((B, S, dk), out_dtype),
        grid_spec=pltpu.PrefetchScalarGridSpec(
            num_scalar_prefetch=0,
            grid=grid,
            in_specs=[
                pl.BlockSpec((batch_block, S, D), lambda i: (i, 0, 0)),   # x
                # Weight / bias are grid-invariant (index_map always (0, 0)).
                pl.BlockSpec((D, 3 * dk), lambda i: (0, 0)),              # fused W
                pl.BlockSpec((1, 3 * dk), lambda i: (0, 0)),              # fused b
            ],
            out_specs=pl.BlockSpec((batch_block, S, dk), lambda i: (i, 0, 0)),
        ),
        compiler_params=pltpu.CompilerParams(
            dimension_semantics=("parallel",),
            # VMEM use is a few KB at these shapes; this cap only matters once B/S grow
            # and the S*S scores tile dominates (size batch_block from that budget on
            # v7x's 64 MiB VMEM; v5e/v6e have 128 MiB headroom).
            vmem_limit_bytes=32 * 1024 * 1024,
        ),
    )(x_bf16, wqkv, bqkv)


def _num_tensorcores_per_chip():
    try:
        kind = jax.devices()[0].device_kind.lower()
    except Exception:
        return 1
    return 2 if ("v7" in kind or "tpu7" in kind or "7x" in kind) else 1


def self_attention(feature, wqkv, bqkv, *, batch_block=None, out_dtype=None):
    """feature: (B, S, D); wqkv: (D, 3*dk) bf16; bqkv: (1, 3*dk) f32 (from prepare_*)."""
    B, S, D = feature.shape
    dk = wqkv.shape[1] // 3
    if out_dtype is None:
        out_dtype = feature.dtype   # preserve module semantics; pass bf16 if downstream allows
    if batch_block is None:
        # >=2 "parallel" grid steps on 2-TC chips (v7x); single step on v5e/v6e where
        # the grid is a serial loop and extra steps are pure per-step overhead.
        n_tc = _num_tensorcores_per_chip()
        batch_block = pl.cdiv(B, n_tc) if (n_tc > 1 and B >= 2) else B
    batch_block = max(1, min(int(batch_block), B))
    return _self_attention_call(feature, wqkv, bqkv, dk=dk,
                                batch_block=batch_block, out_dtype=out_dtype)


def xavier_uniform(key, shape):
    # PyTorch xavier_uniform_ for a (fan_out, fan_in) Linear weight.
    fan_out, fan_in = shape
    limit = math.sqrt(6.0 / (fan_in + fan_out))
    return jax.random.uniform(key, shape, jnp.float32, -limit, limit)


def reference_self_attention(feature, wq, bq, wk, bk, wv, bv, sqrt_dk):
    q = feature @ wq + bq
    k = feature @ wk + bk
    v = feature @ wv + bv
    a = (q @ jnp.swapaxes(k, -2, -1)) / sqrt_dk
    a = jax.nn.softmax(a, axis=-1)
    return a @ v


if __name__ == "__main__":
    # Small shapes consistent with the module: batch=2, seq=8, n_features=32, n_heads=4
    B, S, D, n_heads = 2, 8, 32, 4
    dk = D // n_heads        # = dv = 8
    sqrt_dk = math.sqrt(dk)

    key = jax.random.PRNGKey(0)
    k_x, k_wq, k_wk, k_wv, k_bq, k_bk, k_bv = jax.random.split(key, 7)

    feature = jax.random.normal(k_x, (B, S, D), jnp.float32)

    # PyTorch Linear weights are (out, in); store transposed (in, out) for x @ W.
    wq_t = xavier_uniform(k_wq, (dk, D)).T
    wk_t = xavier_uniform(k_wk, (dk, D)).T
    wv_t = xavier_uniform(k_wv, (dk, D)).T

    bound = 1.0 / math.sqrt(D)   # PyTorch default Linear bias init range
    bq = jax.random.uniform(k_bq, (1, dk), jnp.float32, -bound, bound)
    bk = jax.random.uniform(k_bk, (1, dk), jnp.float32, -bound, bound)
    bv = jax.random.uniform(k_bv, (1, dk), jnp.float32, -bound, bound)

    # One-time parameter prep (hoisted out of the per-call hot path).
    wqkv, bqkv = prepare_self_attention_params(wq_t, bq, wk_t, bk, wv_t, bv, sqrt_dk=sqrt_dk)

    out = self_attention(feature, wqkv, bqkv)
    out = jax.block_until_ready(out)

    ref = reference_self_attention(feature, wq_t, bq, wk_t, bk, wv_t, bv, sqrt_dk)
    assert out.shape == (B, S, dk), out.shape
    # Tolerance loosened vs the pure-f32 reference because the kernel uses bf16 MXU
    # operands (f32 accumulation) for all three contractions.
    assert jnp.allclose(out, ref, atol=5e-2, rtol=5e-2), "mismatch vs reference"

    print("KERNEL_OK")
</pallas_src>

<mosaic_0001>
module attributes {stable_mosaic.version = 11 : i64} {
  func.func @self_attention_kernel(%arg0: i32, %arg1: memref<2x8x32xbf16, #tpu.memory_space<vmem>>, %arg2: memref<32x24xbf16, #tpu.memory_space<vmem>>, %arg3: memref<1x24xf32, #tpu.memory_space<vmem>>, %arg4: memref<2x8x8xf32, #tpu.memory_space<vmem>>) attributes {dimension_semantics = [#tpu.dimension_semantics<parallel>], iteration_bounds = array<i64: 1>, scalar_prefetch = 0 : i64, scratch_operands = 0 : i64, tpu.core_type = #tpu.core_type<tc>, window_params = [{transform_indices = @transform_0, window_bounds = array<i64: 2, 8, 32>}, {pipeline_mode = #tpu.pipeline_mode<synchronous>, transform_indices = @transform_1, window_bounds = array<i64: 32, 24>}, {pipeline_mode = #tpu.pipeline_mode<synchronous>, transform_indices = @transform_2, window_bounds = array<i64: 1, 24>}, {transform_indices = @transform_3, window_bounds = array<i64: 2, 8, 8>}]} {
    %c0 = arith.constant 0 : index
    %c0_0 = arith.constant 0 : index
    %c0_1 = arith.constant 0 : index
    %0 = vector.load %arg1[%c0, %c0_0, %c0_1] : memref<2x8x32xbf16, #tpu.memory_space<vmem>>, vector<2x8x32xbf16>
    %1 = vector.shape_cast %0 : vector<2x8x32xbf16> to vector<16x32xbf16>
    %c0_2 = arith.constant 0 : index
    %c0_3 = arith.constant 0 : index
    %2 = vector.load %arg2[%c0_2, %c0_3] : memref<32x24xbf16, #tpu.memory_space<vmem>>, vector<32x24xbf16>
    %c0_4 = arith.constant 0 : index
    %c0_5 = arith.constant 0 : index
    %3 = vector.load %arg3[%c0_4, %c0_5] : memref<1x24xf32, #tpu.memory_space<vmem>>, vector<1x24xf32>
    %cst = arith.constant dense<0.000000e+00> : vector<16x24xf32>
    %4 = tpu.matmul %1, %2, %cst {dimension_numbers = #tpu.dot_dimension_numbers<[1], [0], [0], [1], [0, 0, 1, 1], [], []>} : vector<16x32xbf16>, vector<32x24xbf16>, vector<16x24xf32> -> vector<16x24xf32>
    %5 = vector.broadcast %3 : vector<1x24xf32> to vector<16x24xf32>
    %6 = arith.addf %4, %5 : vector<16x24xf32>
    %7 = vector.shape_cast %6 : vector<16x24xf32> to vector<2x8x24xf32>
    %8 = vector.extract_strided_slice %7 {offsets = [0, 0, 0], sizes = [2, 8, 8], strides = [1, 1, 1]} : vector<2x8x24xf32> to vector<2x8x8xf32>
    %9 = arith.truncf %8 : vector<2x8x8xf32> to vector<2x8x8xbf16>
    %10 = vector.extract_strided_slice %7 {offsets = [0, 0, 8], sizes = [2, 8, 8], strides = [1, 1, 1]} : vector<2x8x24xf32> to vector<2x8x8xf32>
    %11 = arith.truncf %10 : vector<2x8x8xf32> to vector<2x8x8xbf16>
    %12 = vector.extract_strided_slice %7 {offsets = [0, 0, 16], sizes = [2, 8, 8], strides = [1, 1, 1]} : vector<2x8x24xf32> to vector<2x8x8xf32>
    %13 = arith.truncf %12 : vector<2x8x8xf32> to vector<2x8x8xbf16>
    "tpu.trace_start"() <{level = 10 : i32, message = "bqd,bkd->bqk"}> : () -> ()
    %cst_6 = arith.constant dense<0.000000e+00> : vector<2x8x8xf32>
    %14 = tpu.matmul %9, %11, %cst_6 {dimension_numbers = #tpu.dot_dimension_numbers<[2], [2], [1], [1], [0, 0, 0, 1, 1, 1], [0], [0]>} : vector<2x8x8xbf16>, vector<2x8x8xbf16>, vector<2x8x8xf32> -> vector<2x8x8xf32>
    "tpu.trace_stop"() : () -> ()
    %cst_7 = arith.constant dense<0xFF800000> : vector<2x8xf32>
    %15 = vector.multi_reduction <maximumf>, %14, %cst_7 [2] : vector<2x8x8xf32> to vector<2x8xf32>
    %16 = vector.shape_cast %15 : vector<2x8xf32> to vector<2x8x1xf32>
    %17 = vector.broadcast %16 : vector<2x8x1xf32> to vector<2x8x8xf32>
    %18 = arith.subf %14, %17 : vector<2x8x8xf32>
    %19 = math.exp %18 : vector<2x8x8xf32>
    %cst_8 = arith.constant dense<0.000000e+00> : vector<2x8xf32>
    %20 = vector.multi_reduction <add>, %19, %cst_8 [2] : vector<2x8x8xf32> to vector<2x8xf32>
    %21 = vector.shape_cast %20 : vector<2x8xf32> to vector<2x8x1xf32>
    %22 = tpu.reciprocal %21 : vector<2x8x1xf32> -> vector<2x8x1xf32>
    %23 = vector.broadcast %22 : vector<2x8x1xf32> to vector<2x8x8xf32>
    %24 = arith.mulf %19, %23 : vector<2x8x8xf32>
    %25 = arith.truncf %24 : vector<2x8x8xf32> to vector<2x8x8xbf16>
    "tpu.trace_start"() <{level = 10 : i32, message = "bqk,bkd->bqd"}> : () -> ()
    %cst_9 = arith.constant dense<0.000000e+00> : vector<2x8x8xf32>
    %26 = tpu.matmul %25, %13, %cst_9 {dimension_numbers = #tpu.dot_dimension_numbers<[2], [1], [1], [2], [0, 0, 0, 1, 1, 2], [0], [0]>} : vector<2x8x8xbf16>, vector<2x8x8xbf16>, vector<2x8x8xf32> -> vector<2x8x8xf32>
    "tpu.trace_stop"() : () -> ()
    %c0_10 = arith.constant 0 : index
    %c0_11 = arith.constant 0 : index
    %c0_12 = arith.constant 0 : index
    %27 = vector.load %arg4[%c0_10, %c0_11, %c0_12] : memref<2x8x8xf32, #tpu.memory_space<vmem>>, vector<2x8x8xf32>
    tpu.vector_store %arg4[%c0_10, %c0_11, %c0_12], %26 {strides = array<i32>} : memref<2x8x8xf32, #tpu.memory_space<vmem>>, vector<2x8x8xf32>,
    return
  }
  func.func @transform_0(%arg0: i32) -> (i32, i32, i32) {
    %c0_i32 = arith.constant 0 : i32
    %c0_i32_0 = arith.constant 0 : i32
    %c0_i32_1 = arith.constant 0 : i32
    return %arg0, %c0_i32, %c0_i32_0 : i32, i32, i32
  }
  func.func @transform_1(%arg0: i32) -> (i32, i32) {
    %c0_i32 = arith.constant 0 : i32
    %c0_i32_0 = arith.constant 0 : i32
    %c0_i32_1 = arith.constant 0 : i32
    return %c0_i32, %c0_i32_0 : i32, i32
  }
  func.func @transform_2(%arg0: i32) -> (i32, i32) {
    %c0_i32 = arith.constant 0 : i32
    %c0_i32_0 = arith.constant 0 : i32
    %c0_i32_1 = arith.constant 0 : i32
    return %c0_i32, %c0_i32_0 : i32, i32
  }
  func.func @transform_3(%arg0: i32) -> (i32, i32, i32) {
    %c0_i32 = arith.constant 0 : i32
    %c0_i32_0 = arith.constant 0 : i32
    %c0_i32_1 = arith.constant 0 : i32
    return %arg0, %c0_i32, %c0_i32_0 : i32, i32, i32
  }
}

</mosaic_0001>

<bundles_post_ra>
// kernel: _self_attention_call.1
= control target key start
LH: loop header
LB: loop body
LE: loop exit
PB: predicated region body
PF: predicated region fallthrough
CT: control target
= control target key end

     0   :  { %v425_v1 = vmov 0.0   ;;  %vm426_vm0 = vmmov 0   ;;  %s495_s0 = inlined_call_operand.vmem [shape: bf16[2,8,32], index: 0, kind: input, shape index: {}]   ;;  %s496_s1 = inlined_call_operand.vmem [shape: bf16[32,24], index: 1, kind: input, shape index: {}]   ;;  %s497_s2 = inlined_call_operand.vmem [shape: f32[1,24], index: 2, kind: input, shape index: {}]   ;;  %s498_s3 = inlined_call_operand.hbm [shape: f32[2,8,8], index: 3, kind: output, shape index: {}]  }
   0x1   :  { %v390_v0 = vld [vmem:[%s496_s1] sm:$0xff]   ;;  %351 = vmatprep.subr.bf16.mxu0 %v425_v1  ;;  %359 = vmatprep.subr.bf16.mxu1 %v425_v1  ;;  %v391_v2 = vld [vmem:[%s496_s1 + $0x8] sm:$0xff]  }
   0x2   :  { %352 = vmatpush3.bf16.msra.mxu0 %v390_v0  ;;  %355 = vmatprep.mubr.msk.bf16.mxu0 %vm426_vm0, %v425_v1 }
   0x3   :  { %353 = vmatprep.subr.bf16.mxu0 %v425_v1  ;;  %361 = vmatprep.mubr.msk.bf16.mxu1 %vm426_vm0, %v425_v1 }
   0x4   :  { %8 = vsyncpa [#allocation3], 0  ;;  %v392_v3 = vld [vmem:[%s495_s0] sm:$0xff]   ;;  %vm46_vm1 = vcmask 261120   ;;  %s427_s1 = smov 120   ;;  %vm96_vm2 = vcmask 64512  }
   0x5   :  { %v331_v4 = vld [vmem:[%s497_s2] ss:$0 sm:$0xff]  ;;  %s428_s0 = smov 112   ;;  %vm221_vm3 = vcmask 1043456   ;;  %s429_s2 = smov [#allocation2]  }
   0x6   :  { %354 = vmatpush3.bf16.msra.mxu0 %v391_v2  ;;  %s320_s20 = sshll.u32 %s429_s2, 4  ;;  %s321_s20 = int_to_ptr.vmem [resolvable:$true] %s320_s20 }
   0x7   :  { %365 = vmatprep.subr.bf16.mxu0 %v425_v1  ;;  %s401_s21 = scalar_lea.vmem %s321_s20, 256  ;;  %p406_p1 = scmp.lt.s32.totalorder %s321_s20, %s321_s20 }
   0x8   :  { %p402_p0 = scmp.ne.s32.totalorder %s321_s20, %s401_s21  ;;  %p407_p2 = scmp.lt.s32.totalorder %s401_s21, %s401_s21 }
   0x9   :  { %356 = vmatmul.mubr.msk.bf16.vlgmr.msra.gmra.mrb[0].mxu0 %vm46_vm1, %v392_v3 }
   0xa   :  { %367 = vmatprep.mubr.msk.bf16.mxu0 %vm426_vm0, %v425_v1  ;;  %p408_p3 = por %p407_p2, %p406_p1 }
   0xc   :  { %p409_p4 = pnand %p408_p3, %p402_p0 }
  0xdc   :  { %v84_v5 = vpop.f32.mrb[0].mxu0 }
  0xdd   :  { %v85_v6 = vadd.f32 %v331_v4, %v84_v5  ;;  %v357_v7 = vpop.f32.mrb[1].mxu0 }
  0xde   :  { %v87_v8 = vpop.f32.mrb[2].mxu0 }
  0xdf   :  { %v91_v9 = vpack.c.bf16 %v85_v6, %v85_v6  ;;  %v88_v10 = vadd.f32 %v331_v4, %v87_v8  ;;  %v358_v11 = vpop.f32.mrb[3].mxu0 }
  0xe1   :  { %94 = vrot.lane.b32.xlu0 %v91_v9, %s427_s1  ;;  %v92_v12 = vpack.c.bf16 %v88_v10, %v88_v10 }
  0xe5   :  { %144 = vrot.lane.b32.xlu0 %v92_v12, %s427_s1 }
 0x153   :  { %v95_v13 = vpop.permute.xlu0 %94 }
 0x154   :  { %v101_v14 = vsel %vm96_vm2, %v95_v13, 0 }
 0x155   :  { %360 = vmatpush3.bf16.xpose.msra.mxu1 %v101_v14 }
 0x156   :  { %371 = vmatprep.subr.bf16.mxu1 %v425_v1 }
 0x157   :  { %v145_v15 = vpop.permute.xlu0 %144 }
 0x158   :  { %v150_v16 = vsel %vm96_vm2, %v145_v15, 0 }
 0x159   :  { %366 = vmatpush3.bf16.xpose.msra.mxu0 %v150_v16 }
 0x15a   :  { %377 = vmatprep.subr.bf16.mxu0 %v425_v1 }
 0x15c   :  { %362 = vmatmul.mubr.msk.bf16.vlgmr.msra.gmra.mrb[0].mxu1 %vm96_vm2, %v91_v9 }
 0x15d   :  { %373 = vmatprep.mubr.msk.bf16.mxu1 %vm426_vm0, %v425_v1 }
 0x160   :  { %368 = vmatmul.mubr.msk.bf16.vlgmr.msra.gmra.mrb[4].mxu0 %vm96_vm2, %v92_v12 }
 0x161   :  { %379 = vmatprep.mubr.msk.bf16.mxu0 %vm426_vm0, %v425_v1 }
 0x22f   :  { %v137_v17 = vpop.f32.mrb[0].mxu1 }
 0x230   :  { %v363_v18 = vpop.f32.mrb[1].mxu1  ;;  %v192_v19 = vsel %vm96_vm2, %v137_v17, -inf }
 0x231   :  { %193 = vmax.xlane.f32.xlu1 %v192_v19  ;;  %v140_v20 = vpop.f32.mrb[2].mxu1 }
 0x232   :  { %v364_v21 = vpop.f32.mrb[3].mxu1 }
 0x233   :  { %v186_v22 = vpop.f32.mrb[4].mxu0 }
 0x234   :  { %v369_v23 = vpop.f32.mrb[5].mxu0  ;;  %v195_v24 = vsel %vm96_vm2, %v186_v22, -inf }
 0x235   :  { %196 = vmax.xlane.f32.xlu1 %v195_v24  ;;  %v189_v25 = vpop.f32.mrb[6].mxu0 }
 0x236   :  { %v370_v26 = vpop.f32.mrb[7].mxu0 }
 0x246   :  { %216 = vrot.lane.b32.xlu1 %v91_v9, %s428_s0 }
 0x2be   :  { %v194_v27 = vpop.xlane.xlu1 %193 }
 0x2bf   :  { %v198_v28 = vsub.f32 %v137_v17, %v194_v27 }
 0x2c1   :  { %v200_v29 = vmul.f32 1.442695, %v198_v28 }
 0x2c2   :  { %v197_v30 = vpop.xlane.xlu1 %196 }
 0x2c3   :  { %393 = vpow2.f32 %v200_v29  ;;  %v199_v31 = vsub.f32 %v186_v22, %v197_v30 }
 0x2c5   :  { %v202_v32 = vmul.f32 1.442695, %v199_v31 }
 0x2c6   :  { %v217_v33 = vpop.permute.xlu1 %216 }
 0x2c7   :  { %395 = vpow2.f32 %v202_v32  ;;  %v223_v34 = vsel %vm221_vm3, %v217_v33, 0 }
 0x2c8   :  { %372 = vmatpush3.bf16.msra.mxu1 %v223_v34 }
 0x2cd   :  { %v394_v35 = vpop.eup %393 }
 0x2ce   :  { %v204_v36 = vsel %vm96_vm2, %v394_v35, 0.0 }
 0x2cf   :  { %205 = vadd.xlane.f32.xlu0 %v204_v36 }
 0x2d1   :  { %v396_v37 = vpop.eup %395 }
 0x2d2   :  { %v207_v38 = vsel %vm96_vm2, %v396_v37, 0.0 }
 0x2d3   :  { %208 = vadd.xlane.f32.xlu1 %v207_v38 }
 0x2e4   :  { %265 = vrot.lane.b32.xlu1 %v92_v12, %s428_s0 }
 0x35c   :  { %v206_v39 = vpop.xlane.xlu0 %205 }
 0x35d   :  { %397 = vrcp.f32 %v206_v39 }
 0x360   :  { %v209_v40 = vpop.xlane.xlu1 %208 }
 0x361   :  { %399 = vrcp.f32 %v209_v40 }
 0x364   :  { %v266_v41 = vpop.permute.xlu1 %265 }
 0x365   :  { %v271_v42 = vsel %vm221_vm3, %v266_v41, 0 }
 0x366   :  { %378 = vmatpush3.bf16.msra.mxu0 %v271_v42 }
 0x367   :  { %v398_v43 = vpop.eup %397 }
 0x368   :  { %v212_v44 = vmul.f32 %v398_v43, %v394_v35 }
 0x36a   :  { %v214_v45 = vpack.c.bf16 %v212_v44, %v212_v44 }
 0x36b   :  { %v400_v46 = vpop.eup %399 }
 0x36c   :  { %v213_v47 = vmul.f32 %v400_v46, %v396_v37  ;;  %374 = vmatmul.mubr.msk.bf16.vlgmr.msra.gmra.mrb[4].mxu1 %vm96_vm2, %v214_v45 }
 0x36e   :  { %v215_v48 = vpack.c.bf16 %v213_v47, %v213_v47 }
 0x370   :  { %380 = vmatmul.mubr.msk.bf16.vlgmr.msra.gmra.mrb[8].mxu0 %vm96_vm2, %v215_v48 }
 0x43f   :  { %v259_v49 = vpop.f32.mrb[4].mxu1 }
 0x440   :  { %313 = vst.msk [vmem:[#allocation2] sm:$0xff] %vm96_vm2, %v259_v49  ;;  %v375_v50 = vpop.f32.mrb[5].mxu1 }
 0x441   :  { %v262_v51 = vpop.f32.mrb[6].mxu1 }
 0x442   :  { %v376_v52 = vpop.f32.mrb[7].mxu1 }
 0x443   :  { %v307_v53 = vpop.f32.mrb[8].mxu0 }
 0x444   :  { %314 = vst.msk [vmem:[#allocation2 + $0x8] sm:$0xff] %vm96_vm2, %v307_v53  ;;  %v381_v54 = vpop.f32.mrb[9].mxu0 }
 0x445   :  { %v310_v55 = vpop.f32.mrb[10].mxu0 }
 0x446   :  { %412 = shalt.err (!%p409_p4)
}
 0x447   :  { %s413_s24 = scalar_lea.hbm %s498_s3, 256 }
 0x448   :  { %p414_p5 = scmp.ne.s32.totalorder %s498_s3, %s413_s24  ;;  %p417_p6 = scmp.lt.u32.totalorder %s413_s24, %s498_s3 }
 0x44a   :  { %p419_p7 = pnand %p417_p6, %p414_p5 }
 0x44c   :  { %422 = shalt.err (!%p419_p7)
}
 0x44d   :  { %s430_s29 = smov 128   ;;  %s431_s30 = smov 8   ;;  %v382_v56 = vpop.f32.mrb[11].mxu0 }
 0x44e   :  { %326 = dma.vmem_to_hbm [thread:$0]  %s321_s20, 256, %s498_s3, [#allocation3], %s430_s29, %s430_s29, %s431_s30  }
 0x44f   :  { %423 = dma.done.wait [#allocation3], 256  }
 0x450   :  { %424 = vsyncadd [#allocation3], 4294967040 }
 0x451   :  { %330 = vsyncpa [#allocation3], 1 }

</bundles_post_ra>
